<compile_context>
chip_gen: v7x
topology: tpu7x:2x2x1
jax: 0.10.0
libtpu: 0.0.40
codegen_flags: <defaults>
</compile_context>

<pallas_src>
import jax
import jax.numpy as jnp
from jax.experimental import pallas as pl
from jax.experimental.pallas import tpu as pltpu


# ~1M elements per block: 4 MiB native for f32, 2 MiB for bf16 (plus its f32
# compute temporaries).  With double-buffered input + output this stays well
# under the explicit scoped-VMEM limit below on every generation.
_TARGET_BLOCK_ELEMS = 1 << 20
_VMEM_LIMIT_BYTES = 48 * 1024 * 1024       # < 64 MiB physical on v7x; > 16 MiB v5e default
_LANE_CANDIDATES = (2048, 1024, 512, 256, 128)


def _snake_alt_kernel(x_ref, params_ref, o_ref):
    # params_ref lives in SMEM: [2*omega, 1/(2*omega)] as f32 scalars (free
    # scalar-slot reads; changing omega never recompiles the kernel).
    two_omega = params_ref[0]
    inv_two_omega = params_ref[1]
    # Upcast to f32 for compute (free in a memory-bound kernel), cast on store.
    # Single fused chain with exactly one transcendental (cos).
    x = x_ref[...].astype(jnp.float32)
    t = x + 1.0 - jnp.cos(two_omega * x)
    o_ref[...] = (t * inv_two_omega).astype(o_ref.dtype)


def _sublane_multiple(dtype) -> int:
    # Sub-32-bit dtypes pack along sublanes: rounding block rows to
    # 8 (4-byte) / 16 (2-byte) / 32 (1-byte) keeps stores unmasked.
    return max(8, 32 // jnp.dtype(dtype).itemsize)


def _choose_block_rows(rows: int, lanes: int, sub: int) -> int:
    desired = max(sub, (_TARGET_BLOCK_ELEMS // lanes) // sub * sub)
    if rows > desired:
        return desired                      # grid >= 2 automatically
    if rows >= 2 * sub:
        # Small/medium tensors: still emit >= 2 grid steps so both v7x
        # TensorCores get work and DMA overlaps compute.
        half = (rows + 1) // 2
        return ((half + sub - 1) // sub) * sub
    return rows                             # single block == full dim (legal)


def _run_snake_2d(x2d, params):
    rows, lanes = x2d.shape
    sub = _sublane_multiple(x2d.dtype)
    block_rows = _choose_block_rows(rows, lanes, sub)
    grid = (pl.cdiv(rows, block_rows),)
    return pl.pallas_call(
        _snake_alt_kernel,
        out_shape=jax.ShapeDtypeStruct((rows, lanes), x2d.dtype),
        grid=grid,
        in_specs=[
            pl.BlockSpec((block_rows, lanes), lambda i: (i, 0)),
            pl.BlockSpec(memory_space=pltpu.MemorySpace.SMEM),
        ],
        out_specs=pl.BlockSpec((block_rows, lanes), lambda i: (i, 0)),
        compiler_params=pltpu.CompilerParams(
            dimension_semantics=("parallel",),
            vmem_limit_bytes=_VMEM_LIMIT_BYTES,
        ),
    )(x2d, params)


@jax.jit
def _snake_alt_impl(x, omega):
    orig_shape = x.shape
    orig_dtype = x.dtype

    two_omega = 2.0 * jnp.asarray(omega, jnp.float32)
    inv_two_omega = 1.0 / two_omega          # NOTE: omega == 0 is undefined (matches PyTorch)
    params = jnp.stack([two_omega, inv_two_omega])

    def jnp_snake(v):                        # tail / tiny-input path, same math
        v32 = v.astype(jnp.float32)
        return ((v32 + 1.0 - jnp.cos(two_omega * v32)) * inv_two_omega).astype(orig_dtype)

    flat = x.reshape(-1)
    n = flat.shape[0]

    # Aligned path: widest lane dim dividing n -> the 2D reshape is a free
    # bitcast; total HBM traffic is the ideal 2n words.
    for cand in _LANE_CANDIDATES:
        if n % cand == 0:
            rows = n // cand
            out2d = _run_snake_2d(flat.reshape(rows, cand), params)
            return out2d.reshape(orig_shape)

    # Ragged path: no pad/slice round trip.  Kernel covers the lane-aligned
    # bulk prefix; the <= lanes-1 tail elements go through plain jnp.
    lanes = next((c for c in _LANE_CANDIDATES if n >= c), None)
    if lanes is None:
        # Fewer than 128 elements: a kernel launch is pure overhead.
        return jnp_snake(flat).reshape(orig_shape)

    rows = n // lanes
    bulk_n = rows * lanes
    out_bulk = _run_snake_2d(flat[:bulk_n].reshape(rows, lanes), params)
    out_flat = jnp.concatenate([out_bulk.reshape(-1), jnp_snake(flat[bulk_n:])])
    return out_flat.reshape(orig_shape)


def snake_alt(x, omega=1.0):
    """Elementwise SnakeAlt: (x + 1 - cos(2*omega*x)) / (2*omega)."""
    return _snake_alt_impl(x, omega)


def snake_alt_ref(x, omega=1.0):
    two_omega = 2.0 * float(omega)
    xf = x.astype(jnp.float32)
    return ((xf + 1.0 - jnp.cos(two_omega * xf)) / two_omega).astype(x.dtype)


if __name__ == "__main__":
    key = jax.random.PRNGKey(0)
    k1, k2, k3, k4, k5 = jax.random.split(key, 5)

    # NCHW input, as in the PyTorch module (aligned path, single block).
    x1 = jax.random.normal(k1, (2, 4, 16, 16), dtype=jnp.float32)
    out1 = jax.block_until_ready(snake_alt(x1, 1.0))
    assert out1.shape == x1.shape and out1.dtype == x1.dtype
    assert jnp.allclose(out1, snake_alt_ref(x1, 1.0), atol=1e-5, rtol=1e-5), "mismatch (f32)"

    # Larger aligned tensor: exercises the multi-step (>= 2) grid.
    x2 = jax.random.normal(k2, (2, 8, 64, 64), dtype=jnp.float32)
    out2 = jax.block_until_ready(snake_alt(x2, 0.5))
    assert out2.shape == x2.shape and out2.dtype == x2.dtype
    assert jnp.allclose(out2, snake_alt_ref(x2, 0.5), atol=1e-5, rtol=1e-5), "mismatch (multi-block)"

    # Ragged sizes: tiny (pure-jnp path) and bulk+tail stitch path.
    x3 = jax.random.normal(k3, (3, 5, 7), dtype=jnp.float32)
    out3 = jax.block_until_ready(snake_alt(x3, 1.0))
    assert out3.shape == x3.shape and out3.dtype == x3.dtype
    assert jnp.allclose(out3, snake_alt_ref(x3, 1.0), atol=1e-5, rtol=1e-5), "mismatch (tiny ragged)"

    x4 = jax.random.normal(k4, (2, 3, 11, 13), dtype=jnp.float32)
    out4 = jax.block_until_ready(snake_alt(x4, 1.0))
    assert out4.shape == x4.shape and out4.dtype == x4.dtype
    assert jnp.allclose(out4, snake_alt_ref(x4, 1.0), atol=1e-5, rtol=1e-5), "mismatch (ragged bulk+tail)"

    # bf16 input: kernel computes in f32 internally, casts on store.
    x5 = jax.random.normal(k5, (2, 4, 16, 16), dtype=jnp.bfloat16)
    out5 = jax.block_until_ready(snake_alt(x5, 1.0))
    assert out5.shape == x5.shape and out5.dtype == x5.dtype
    assert jnp.allclose(
        out5.astype(jnp.float32), snake_alt_ref(x5, 1.0).astype(jnp.float32),
        atol=2e-2, rtol=2e-2
    ), "mismatch (bf16)"

    print("KERNEL_OK")
</pallas_src>

<mosaic_0001>
module attributes {stable_mosaic.version = 11 : i64} {
  func.func @_snake_alt_kernel(%arg0: i32, %arg1: memref<1x2048xf32, #tpu.memory_space<vmem>>, %arg2: memref<2xf32, #tpu.memory_space<smem>>, %arg3: memref<1x2048xf32, #tpu.memory_space<vmem>>) attributes {dimension_semantics = [#tpu.dimension_semantics<parallel>], iteration_bounds = array<i64: 1>, scalar_prefetch = 0 : i64, scratch_operands = 0 : i64, tpu.core_type = #tpu.core_type<tc>, window_params = [{transform_indices = @transform_0, window_bounds = array<i64: 1, 2048>}, {transform_indices = @transform_1, window_bounds = array<i64: 2>}, {transform_indices = @transform_2, window_bounds = array<i64: 1, 2048>}]} {
    %c0 = arith.constant 0 : index
    %0 = memref.load %arg2[%c0] : memref<2xf32, #tpu.memory_space<smem>>
    %c1 = arith.constant 1 : index
    %1 = memref.load %arg2[%c1] : memref<2xf32, #tpu.memory_space<smem>>
    %c0_0 = arith.constant 0 : index
    %c0_1 = arith.constant 0 : index
    %2 = vector.load %arg1[%c0_0, %c0_1] : memref<1x2048xf32, #tpu.memory_space<vmem>>, vector<1x2048xf32>
    %cst = arith.constant 1.000000e+00 : f32
    %3 = vector.broadcast %cst : f32 to vector<1x2048xf32>
    %4 = arith.addf %2, %3 : vector<1x2048xf32>
    %5 = vector.broadcast %0 : f32 to vector<1x2048xf32>
    %6 = arith.mulf %5, %2 : vector<1x2048xf32>
    %7 = math.cos %6 : vector<1x2048xf32>
    %8 = arith.subf %4, %7 : vector<1x2048xf32>
    %9 = vector.broadcast %1 : f32 to vector<1x2048xf32>
    %10 = arith.mulf %8, %9 : vector<1x2048xf32>
    %c0_2 = arith.constant 0 : index
    %c0_3 = arith.constant 0 : index
    %11 = vector.load %arg3[%c0_2, %c0_3] : memref<1x2048xf32, #tpu.memory_space<vmem>>, vector<1x2048xf32>
    tpu.vector_store %arg3[%c0_2, %c0_3], %10 {strides = array<i32>} : memref<1x2048xf32, #tpu.memory_space<vmem>>, vector<1x2048xf32>,
    return
  }
  func.func @transform_0(%arg0: i32) -> (i32, i32) {
    %c0_i32 = arith.constant 0 : i32
    %c0_i32_0 = arith.constant 0 : i32
    return %arg0, %c0_i32 : i32, i32
  }
  func.func @transform_1(%arg0: i32) -> i32 {
    %c0_i32 = arith.constant 0 : i32
    %c0_i32_0 = arith.constant 0 : i32
    return %c0_i32 : i32
  }
  func.func @transform_2(%arg0: i32) -> (i32, i32) {
    %c0_i32 = arith.constant 0 : i32
    %c0_i32_0 = arith.constant 0 : i32
    return %arg0, %c0_i32 : i32, i32
  }
}

</mosaic_0001>

<bundles_post_ra>
// kernel: _snake_alt_impl.1
= control target key start
LH: loop header
LB: loop body
LE: loop exit
PB: predicated region body
PF: predicated region fallthrough
CT: control target
= control target key end

     0   :  { %7 = vsyncpa [#allocation3], 0  ;;  %s431_s0 = inlined_call_operand.vmem [shape: f32[1,2048], index: 0, kind: input, shape index: {}]   ;;  %s432_s1 = inlined_call_operand.vmem [shape: f32[2], index: 1, kind: input, shape index: {}]   ;;  %s433_s2 = inlined_call_operand.vmem [shape: f32[1,2048], index: 2, kind: output, shape index: {}]  }
   0x1   :  { %s16_s11 = sshll.u32 %s432_s1, 4  ;;  %s17_s11 = int_to_ptr.vmem [resolvable:$true] %s16_s11 }
   0x2   :  { %s283_s12 = scalar_lea.vmem %s17_s11, 16  ;;  %p288_p1 = scmp.lt.s32.totalorder %s17_s11, %s17_s11 }
   0x3   :  { %p284_p0 = scmp.ne.s32.totalorder %s17_s11, %s283_s12  ;;  %p289_p2 = scmp.lt.s32.totalorder %s283_s12, %s283_s12 }
   0x5   :  { %p290_p3 = por %p289_p2, %p288_p1 }
   0x7   :  { %p291_p4 = pnand %p290_p3, %p284_p0 }
   0x9   :  { %294 = shalt.err (!%p291_p4)
}
   0xa   :  { %s297_s13 = smov [#allocation2]  }
   0xb   :  { %19 = dma.vmem_to_smem %s17_s11, 16, %s297_s13, [#allocation3]  }
   0xc   :  { %295 = dma.done.wait [#allocation3], 16  }
   0xd   :  { %296 = vsyncadd [#allocation3], 4294967280 }
   0xe   :  { %23 = sfence }
   0xf   :  { %s24_s14 = sld [smem:[#allocation2]]  ;;  %v325_v0 = vld [vmem:[%s431_s0] sm:$0xff]  ;;  %v330_v1 = vld [vmem:[%s431_s0 + $0x8] sm:$0xff]  ;;  %v298_v27 = vmov 683565275   ;;  %s413_s0 = sld [smem:[#allocation2 + $0x1]] }
  0x10   :  { %v299_v29 = vmov 2475754826   ;;  %v300_v31 = vmov 2131351028   ;;  %v301_v33 = vmov 2102212464  }
  0x11   :  { %v302_v35 = vmov 920167782   ;;  %v303_v43 = vmov 1326507024  }
  0x15   :  { %v30_v2 = vstv %s24_s14 }
  0x16   :  { %v333_v3 = vmul.f32 %v30_v2, %v325_v0  ;;  %v336_v4 = vmul.f32 %v30_v2, %v330_v1 }
  0x18   :  { %v33_v5 = vand.u32 2147483647, %v333_v3  ;;  %v36_v6 = vand.u32 2139095040, %v333_v3  ;;  %v136_v7 = vand.u32 2147483647, %v336_v4  ;;  %v139_v8 = vand.u32 2139095040, %v336_v4 }
  0x19   :  { %vm35_vm14 = vcmp.lt.s32.totalorder %v333_v3, 0 }
  0x1a   :  { %v37_v9 = vshrl.u32 %v36_v6, 23  ;;  %v40_v10 = vand.u32 8388607, %v33_v5  ;;  %v140_v11 = vshrl.u32 %v139_v8, 23  ;;  %v143_v12 = vand.u32 8388607, %v136_v7 }
  0x1b   :  { %vm397_vm15 = vcmp.le.f32.partialorder %v33_v5, 0.7853982 }
  0x1c   :  { %v252_v13 = vadd.s32 4294967169, %v37_v9  ;;  %v256_v14 = vadd.s32 4294967169, %v140_v11  ;;  %v41_v16 = vor.u32 8388608, %v40_v10  ;;  %v144_v17 = vor.u32 8388608, %v143_v12 }
  0x1e   :  { %v43_v15 = vadd.s32 1, %v252_v13  ;;  %v146_v18 = vadd.s32 1, %v256_v14  ;;  %v346_v23 = vshll.u32 %v41_v16, 8  ;;  %v348_v25 = vshll.u32 %v144_v17, 8 }
  0x20   :  { %vm44_vm0 = vcmp.gt.s32.totalorder %v43_v15, 0  ;;  %vm147_vm1 = vcmp.gt.s32.totalorder %v146_v18, 0 }
  0x21   :  { %v45_v19 = vsel %vm44_vm0, %v43_v15, 0  ;;  %v148_v22 = vsel %vm147_vm1, %v146_v18, 0  ;;  %vm138_vm0 = vcmp.lt.s32.totalorder %v336_v4, 0  ;;  %vm409_vm1 = vcmp.le.f32.partialorder %v136_v7, 0.7853982 }
  0x22   :  { %v46_v20 = vshrl.u32 %v45_v19, 5  ;;  %v47_v21 = vand.u32 31, %v45_v19  ;;  %v150_v24 = vand.u32 31, %v148_v22  ;;  %v350_v37 = vshrl.u32 %v148_v22, 5 }
  0x24   :  { %v48_v26 = vsub.s32 32, %v47_v21  ;;  %v50_v28 = vshll.u32 %v298_v27, %v47_v21  ;;  %v53_v30 = vshll.u32 %v299_v29, %v47_v21  ;;  %v56_v32 = vshll.u32 %v300_v31, %v47_v21 }
  0x25   :  { %v59_v34 = vshll.u32 %v301_v33, %v47_v21  ;;  %v62_v36 = vshll.u32 %v302_v35, %v47_v21  ;;  %vm65_vm2 = vcmp.lt.s32.totalorder %v46_v20, 1  ;;  %vm66_vm3 = vcmp.lt.s32.totalorder %v46_v20, 2 }
  0x26   :  { %v49_v38 = vshrl.u32 %v298_v27, %v48_v26  ;;  %v51_v39 = vshrl.u32 %v299_v29, %v48_v26  ;;  %v54_v40 = vshrl.u32 %v300_v31, %v48_v26  ;;  %v57_v41 = vshrl.u32 %v301_v33, %v48_v26 }
  0x27   :  { %v60_v42 = vshrl.u32 %v302_v35, %v48_v26  ;;  %v63_v44 = vshrl.u32 %v303_v43, %v48_v26  ;;  %vm68_vm4 = vcmp.lt.s32.totalorder %v46_v20, 4  ;;  %v151_v48 = vsub.s32 32, %v150_v24 }
  0x28   :  { %v52_v45 = vor.u32 %v51_v39, %v50_v28  ;;  %v55_v46 = vor.u32 %v54_v40, %v53_v30  ;;  %v58_v47 = vor.u32 %v57_v41, %v56_v32  ;;  %vm67_vm5 = vcmp.lt.s32.totalorder %v46_v20, 3 }
  0x29   :  { %v61_v49 = vor.u32 %v60_v42, %v59_v34  ;;  %v64_v50 = vor.u32 %v63_v44, %v62_v36  ;;  %v153_v51 = vshll.u32 %v298_v27, %v150_v24  ;;  %v156_v59 = vshll.u32 %v299_v29, %v150_v24 }
  0x2a   :  { %v69_v52 = vsel %vm65_vm2, %v49_v38, %v52_v45  ;;  %v70_v53 = vsel %vm68_vm4, %v58_v47, 2102212464  ;;  %v73_v54 = vsel %vm65_vm2, %v52_v45, %v55_v46  ;;  %v77_v55 = vsel %vm65_vm2, %v55_v46, %v58_v47 }
  0x2b   :  { %v71_v56 = vsel %vm67_vm5, %v55_v46, %v70_v53  ;;  %v74_v57 = vsel %vm68_vm4, %v61_v49, 920167782  ;;  %v78_v58 = vsel %vm68_vm4, %v64_v50, 1326507024  ;;  %v152_v62 = vshrl.u32 %v298_v27, %v151_v48 }
  0x2c   :  { %v75_v60 = vsel %vm67_vm5, %v58_v47, %v74_v57  ;;  %v79_v61 = vsel %vm67_vm5, %v61_v49, %v78_v58  ;;  %v154_v63 = vshrl.u32 %v299_v29, %v151_v48  ;;  %v72_v2 = vsel %vm66_vm3, %v69_v52, %v71_v56 }
  0x2d   :  { %v76_v6 = vsel %vm66_vm3, %v73_v54, %v75_v60  ;;  %v80_v8 = vsel %vm66_vm3, %v77_v55, %v79_v61  ;;  %v157_v9 = vshrl.u32 %v300_v31, %v151_v48  ;;  %v159_v16 = vshll.u32 %v300_v31, %v150_v24 }
  0x2e   :  { %v359_v10 = vmul.u32.u64.low %v346_v23, %v80_v8  ;;  %v360_v11 = vmul.u32.u64.high %v346_v23, %v80_v8, %v359_v10  ;;  %v363_v12 = vmul.u32.u64.low %v346_v23, %v76_v6  ;;  %v364_v13 = vmul.u32.u64.high %v346_v23, %v76_v6, %v363_v12 }
  0x2f   :  { %v155_v14 = vor.u32 %v154_v63, %v153_v51  ;;  %v158_v15 = vor.u32 %v157_v9, %v156_v59  ;;  %v160_v17 = vshrl.u32 %v301_v33, %v151_v48  ;;  %v162_v18 = vshll.u32 %v301_v33, %v150_v24 }
  0x30   :  { %v163_v19 = vshrl.u32 %v302_v35, %v151_v48  ;;  %v165_v21 = vshll.u32 %v302_v35, %v150_v24  ;;  %v166_v22 = vshrl.u32 %v303_v43, %v151_v48  ;;  %v88_v20 = vmul.u32 %v346_v23, %v72_v2 }
  0x31   :  { %v161_v26 = vor.u32 %v160_v17, %v159_v16  ;;  %vm168_vm6 = vcmp.lt.s32.totalorder %v350_v37, 1  ;;  %vm169_vm7 = vcmp.lt.s32.totalorder %v350_v37, 2  ;;  %vm90_vm8 = vc.u32 %v360_v11, %v363_v12 }
  0x32   :  { %v91_v27 = vadd.s32 1, %v364_v13  ;;  %v164_v28 = vor.u32 %v163_v19, %v162_v18  ;;  %vm170_vm9 = vcmp.lt.s32.totalorder %v350_v37, 3  ;;  %v167_v29 = vor.u32 %v166_v22, %v165_v21 }
  0x33   :  { %vm171_vm10 = vcmp.lt.s32.totalorder %v350_v37, 4  ;;  %v172_v30 = vsel %vm168_vm6, %v152_v62, %v155_v14  ;;  %v176_v24 = vsel %vm168_vm6, %v155_v14, %v158_v15  ;;  %v180_v33 = vsel %vm168_vm6, %v158_v15, %v161_v26 }
  0x34   :  { %v92_v31 = vsel %vm90_vm8, %v91_v27, %v364_v13  ;;  %v173_v23 = vsel %vm171_vm10, %v161_v26, 2102212464  ;;  %v177_v32 = vsel %vm171_vm10, %v164_v28, 920167782  ;;  %v181_v38 = vsel %vm171_vm10, %v167_v29, 1326507024 }
  0x35   :  { %v93_v34 = vadd.s32 %v92_v31, %v88_v20  ;;  %v174_v35 = vsel %vm170_vm9, %v158_v15, %v173_v23  ;;  %v178_v36 = vsel %vm170_vm9, %v161_v26, %v177_v32  ;;  %v182_v41 = vsel %vm170_vm9, %v164_v28, %v181_v38 }
  0x36   :  { %v175_v39 = vsel %vm169_vm7, %v172_v30, %v174_v35  ;;  %v179_v40 = vsel %vm169_vm7, %v176_v24, %v178_v36  ;;  %v183_v43 = vsel %vm169_vm7, %v180_v33, %v182_v41  ;;  %v89_v62 = vadd.s32 %v363_v12, %v360_v11 }
  0x37   :  { %v94_v42 = vadd.s32 536870912, %v93_v34  ;;  %v381_v44 = vmul.u32.u64.low %v348_v25, %v179_v40  ;;  %v382_v45 = vmul.u32.u64.high %v348_v25, %v179_v40, %v381_v44  ;;  %v191_v49 = vmul.u32 %v348_v25, %v175_v39 }
  0x38   :  { %v385_v46 = vmul.u32.u64.low %v348_v25, %v183_v43  ;;  %v386_v47 = vmul.u32.u64.high %v348_v25, %v183_v43, %v385_v46  ;;  %vm125_vm5 = vweird.f32 %v333_v3  ;;  %vm228_vm9 = vweird.f32 %v336_v4 }
  0x39   :  { %v95_v48 = vshrl.u32 %v94_v42, 30  ;;  %v194_v51 = vadd.s32 1, %v382_v45 }
  0x3a   :  { %vm193_vm11 = vc.u32 %v386_v47, %v381_v44  ;;  %v192_v21 = vadd.s32 %v381_v44, %v386_v47 }
  0x3b   :  { %v96_v50 = vshll.u32 %v95_v48, 30  ;;  %v195_v37 = vsel %vm193_vm11, %v194_v51, %v382_v45  ;;  %v119_v31 = vsub.s32 4, %v95_v48 }
  0x3c   :  { %v196_v53 = vadd.s32 %v195_v37, %v191_v49 }
  0x3d   :  { %v97_v52 = vsub.s32 %v93_v34, %v96_v50  ;;  %v120_v38 = vsel %vm35_vm14, %v119_v31, %v95_v48 }
  0x3e   :  { %v197_v55 = vadd.s32 536870912, %v196_v53  ;;  %v122_v5 = vsel %vm397_vm15, 0, %v120_v38 }
  0x3f   :  { %v99_v54 = vsub.s32 0, %v97_v52  ;;  %v126_v44 = vand.u32 3, %v122_v5 }
  0x40   :  { %v198_v57 = vshrl.u32 %v197_v55, 30 }
  0x41   :  { %v253_v56 = vmin.u32 %v99_v54, %v97_v52  ;;  %vm131_vm2 = vcmp.eq.s32.totalorder %v126_v44, 2  ;;  %vm128_vm3 = vcmp.eq.s32.totalorder %v126_v44, 0  ;;  %vm127_vm4 = vcmp.lt.s32.totalorder %v126_v44, 2 }
  0x42   :  { %v199_v59 = vshll.u32 %v198_v57, 30  ;;  %v222_v43 = vsub.s32 4, %v198_v57 }
  0x43   :  { %v101_v58 = vclz %v253_v56 }
  0x44   :  { %v200_v61 = vsub.s32 %v196_v53, %v199_v59  ;;  %v223_v47 = vsel %vm138_vm0, %v222_v43, %v198_v57  ;;  %v241_v57 = vstv %s413_s0 }
  0x45   :  { %v254_v60 = vadd.s32 4294967294, %v101_v58  ;;  %v225_v51 = vsel %vm409_vm1, 0, %v223_v47 }
  0x46   :  { %v202_v63 = vsub.s32 0, %v200_v61  ;;  %v229_v55 = vand.u32 3, %v225_v51 }
  0x47   :  { %vm255_vm12 = vcmp.lt.s32.totalorder %v254_v60, 0 }
  0x48   :  { %v104_v25 = vsel %vm255_vm12, 0, %v254_v60  ;;  %v257_v9 = vmin.u32 %v202_v63, %v200_v61  ;;  %vm234_vm6 = vcmp.eq.s32.totalorder %v229_v55, 2  ;;  %vm231_vm7 = vcmp.eq.s32.totalorder %v229_v55, 0 }
  0x49   :  { %v105_v2 = vsub.s32 32, %v104_v25  ;;  %v106_v6 = vshll.u32 %v97_v52, %v104_v25  ;;  %v109_v8 = vsub.s32 4294967266, %v104_v25  ;;  %v28_v52 = vadd.f32 1.0, %v325_v0 }
  0x4a   :  { %v204_v14 = vclz %v257_v9  ;;  %vm230_vm8 = vcmp.lt.s32.totalorder %v229_v55, 2  ;;  %v29_v0 = vadd.f32 1.0, %v330_v1 }
  0x4b   :  { %v107_v10 = vshrl.u32 %v89_v62, %v105_v2  ;;  %v110_v13 = vadd.s32 127, %v109_v8 }
  0x4c   :  { %v258_v17 = vadd.s32 4294967294, %v204_v14 }
  0x4d   :  { %v108_v15 = vor.u32 %v107_v10, %v106_v6  ;;  %v111_v16 = vshll.u32 %v110_v13, 23 }
  0x4e   :  { %vm259_vm13 = vcmp.lt.s32.totalorder %v258_v17, 0 }
  0x4f   :  { %v112_v18 = vor.u32 4788187, %v111_v16  ;;  %v115_v19 = vcvt.s32.f32 %v108_v15  ;;  %v207_v11 = vsel %vm259_vm13, 0, %v258_v17 }
  0x50   :  { %v208_v12 = vsub.s32 32, %v207_v11  ;;  %v209_v20 = vshll.u32 %v200_v61, %v207_v11  ;;  %v212_v26 = vsub.s32 4294967266, %v207_v11 }
  0x51   :  { %v113_v22 = vand.u32 2147483647, %v112_v18 }
  0x52   :  { %v210_v28 = vshrl.u32 %v192_v21, %v208_v12  ;;  %v213_v29 = vadd.s32 127, %v212_v26 }
  0x53   :  { %v116_v27 = vmul.f32 %v115_v19, %v113_v22 }
  0x54   :  { %v211_v23 = vor.u32 %v210_v28, %v209_v20  ;;  %v214_v32 = vshll.u32 %v213_v29, 23 }
  0x55   :  { %v117_v24 = vxor.u32 2147483648, %v116_v27 }
  0x56   :  { %v215_v35 = vor.u32 4788187, %v214_v32  ;;  %v218_v36 = vcvt.s32.f32 %v211_v23 }
  0x57   :  { %v118_v33 = vsel %vm35_vm14, %v117_v24, %v116_v27 }
  0x58   :  { %v121_v34 = vsel %vm397_vm15, %v333_v3, %v118_v33  ;;  %v216_v39 = vand.u32 2147483647, %v215_v35 }
  0x59   :  { %275 = vcosq.f32 %v121_v34 }
  0x5a   :  { %277 = vsinq.f32 %v121_v34  ;;  %v219_v40 = vmul.f32 %v218_v36, %v216_v39 }
  0x5c   :  { %v220_v42 = vxor.u32 2147483648, %v219_v40 }
  0x5e   :  { %v221_v45 = vsel %vm138_vm0, %v220_v42, %v219_v40 }
  0x5f   :  { %v224_v46 = vsel %vm409_vm1, %v336_v4, %v221_v45 }
  0x60   :  { %279 = vcosq.f32 %v224_v46 }
  0x61   :  { %281 = vsinq.f32 %v224_v46 }
  0x63   :  { %v276_v48 = vpop.eup %275 }
  0x64   :  { %v278_v7 = vpop.eup %277  ;;  %v132_v49 = vxor.u32 2147483648, %v276_v48 }
  0x65   :  { %v129_v50 = vxor.u32 2147483648, %v278_v7 }
  0x66   :  { %v133_v37 = vsel %vm131_vm2, %v132_v49, %v278_v7 }
  0x67   :  { %v130_v53 = vsel %vm128_vm3, %v276_v48, %v129_v50 }
  0x68   :  { %v134_v54 = vsel %vm127_vm4, %v130_v53, %v133_v37 }
  0x69   :  { %v135_v56 = vsel %vm125_vm5, nan, %v134_v54 }
  0x6a   :  { %v239_v58 = vsub.f32 %v28_v52, %v135_v56  ;;  %v280_v59 = vpop.eup %279 }
  0x6b   :  { %v282_v61 = vpop.eup %281  ;;  %v235_v62 = vxor.u32 2147483648, %v280_v59 }
  0x6c   :  { %v242_v60 = vmul.f32 %v241_v57, %v239_v58  ;;  %v232_v25 = vxor.u32 2147483648, %v282_v61 }
  0x6d   :  { %v236_v3 = vsel %vm234_vm6, %v235_v62, %v282_v61 }
  0x6e   :  { %244 = vst [vmem:[%s433_s2] sm:$0xff] %v242_v60  ;;  %v233_v63 = vsel %vm231_vm7, %v280_v59, %v232_v25 }
  0x6f   :  { %v237_v2 = vsel %vm230_vm8, %v233_v63, %v236_v3 }
  0x70   :  { %v238_v6 = vsel %vm228_vm9, nan, %v237_v2 }
  0x71   :  { %v240_v8 = vsub.f32 %v29_v0, %v238_v6 }
  0x73   :  { %v243_v9 = vmul.f32 %v241_v57, %v240_v8 }
  0x75   :  { %245 = vst [vmem:[%s433_s2 + $0x8] sm:$0xff] %v243_v9 }
  0x76   :  { %250 = vsyncpa [#allocation3], 1 }

</bundles_post_ra>
